<compile_context>
chip_gen: v5e
topology: v5e:2x2
jax: 0.10.0
libtpu: 0.0.40
codegen_flags: <defaults>
</compile_context>

<pallas_src>
import jax
import jax.numpy as jnp
from jax.experimental import pallas as pl
from jax.experimental.pallas import tpu as pltpu

KERNEL_SIZE = 25
PAD = (KERNEL_SIZE - 1) // 2  # 12

# Keep double-buffered streamed tiles (x in + out) inside this budget; together
# with the resident (P,L) weight this stays under the 48 MiB scoped limit we
# request, which is itself safe on v7x's 64 MiB/TC as well as v5e/v6e's 128 MiB.
_VMEM_TILE_BUDGET = 36 * 1024 * 1024
_VMEM_LIMIT_BYTES = 48 * 1024 * 1024
_MAX_BATCH_TILE = 8  # static in-kernel unroll bound


def _moving_avg_matrix(seq_len):
    """(L, L) matrix A with (A @ x)[t] = AvgPool1d(k=25, stride=1) over the
    replication-padded series.  Banded O(L^2) construction (no one_hot)."""
    t = jnp.arange(seq_len, dtype=jnp.int32)[:, None]            # (L, 1)
    s = jnp.arange(seq_len, dtype=jnp.int32)[None, :]            # (1, L)
    band = (jnp.abs(t - s) <= PAD).astype(jnp.float32)           # interior taps
    # Replication padding: columns 0 and L-1 absorb all clamped taps.
    cnt_lo = jnp.clip(PAD - t[:, 0] + 1, 0, KERNEL_SIZE).astype(jnp.float32)
    cnt_hi = jnp.clip(t[:, 0] + PAD - seq_len + 2, 0, KERNEL_SIZE).astype(jnp.float32)
    A = band.at[:, 0].set(cnt_lo).at[:, -1].set(cnt_hi)
    return A * jnp.float32(1.0 / KERNEL_SIZE)


def fold_dlinear_params(w_seasonal, b_seasonal, w_trend, b_trend, seq_len):
    """Fold decomposition + both Linears into (W_eff, b_eff).
    Call ONCE at model-build time (hoisted out of the per-forward path)."""
    A = _moving_avg_matrix(seq_len)                              # (L, L)
    w_eff = w_seasonal + (w_trend - w_seasonal) @ A              # (P, L)
    b_eff = (b_seasonal + b_trend).reshape(-1, 1)                # (P, 1)
    return w_eff, b_eff


def _dlinear_kernel(w_ref, b_ref, x_ref, o_ref):
    # w_ref: (P, L)   b_ref: (P, 1)   x_ref: (tb, L, tc)   o_ref: (tb, P, tc)
    w = w_ref[...]
    b = b_ref[...]
    for i in range(x_ref.shape[0]):          # static unroll over the batch tile
        o_ref[i] = (
            jnp.dot(w, x_ref[i], preferred_element_type=jnp.float32) + b
        ).astype(o_ref.dtype)


def _pick_tiles(B, L, P, C):
    """Batch tile (in-kernel unroll) and channel tile (lane dim) from a VMEM budget."""
    tb = 1 if C >= 128 else min(B, _MAX_BATCH_TILE)
    bytes_per_chan = 4 * tb * (L + P)                    # f32, x-tile + out-tile
    max_tc = _VMEM_TILE_BUDGET // (2 * bytes_per_chan)   # 2 = double buffering
    if C <= max_tc:
        tc = C                                 # whole channel axis, single block
    else:
        tc = max(128, (max_tc // 128) * 128)   # lane-dense 128-multiple tile
    return tb, tc


def dlinear_forward(x, w_eff, b_eff):
    """DLinear forward (individual=False).  x: (B, L, C) f32 -> (B, P, C) f32."""
    B, L, C = x.shape
    P = w_eff.shape[0]
    tb, tc = _pick_tiles(B, L, P, C)
    grid = (pl.cdiv(B, tb), pl.cdiv(C, tc))

    cost = pl.CostEstimate(
        flops=2 * P * L * B * C,
        transcendentals=0,
        bytes_accessed=4 * (P * L + P + B * L * C + B * P * C),
    )

    return pl.pallas_call(
        _dlinear_kernel,
        out_shape=jax.ShapeDtypeStruct((B, P, C), jnp.float32),
        grid_spec=pltpu.PrefetchScalarGridSpec(
            num_scalar_prefetch=0,
            grid=grid,
            in_specs=[
                # NOTE: constant index_map -> Pallas skips re-DMA across steps.
                # (pipeline_mode=pl.Buffered(1) would also drop the redundant
                #  second buffer; left default for maximum compile robustness.)
                pl.BlockSpec((P, L), lambda bi, ci: (0, 0)),     # fused weight
                pl.BlockSpec((P, 1), lambda bi, ci: (0, 0)),     # fused bias
                pl.BlockSpec((tb, L, tc), lambda bi, ci: (bi, 0, ci)),  # x native
            ],
            out_specs=pl.BlockSpec((tb, P, tc), lambda bi, ci: (bi, 0, ci)),
        ),
        compiler_params=pltpu.CompilerParams(
            dimension_semantics=("parallel", "parallel"),
            vmem_limit_bytes=_VMEM_LIMIT_BYTES,
        ),
        cost_estimate=cost,
    )(w_eff, b_eff, x)


def _reference(x, w_s, b_s, w_t, b_t):
    """Pure-JAX reference mirroring the PyTorch forward (individual=False)."""
    front = jnp.repeat(x[:, 0:1, :], PAD, axis=1)
    end = jnp.repeat(x[:, -1:, :], PAD, axis=1)
    xpad = jnp.concatenate([front, x, end], axis=1)                    # (B, Lp, C)
    L = x.shape[1]
    mm = jnp.stack([xpad[:, j:j + L, :] for j in range(KERNEL_SIZE)], 0).mean(0)
    res = x - mm
    seasonal_init = jnp.transpose(res, (0, 2, 1))                      # (B, C, L)
    trend_init = jnp.transpose(mm, (0, 2, 1))
    seasonal_out = seasonal_init @ w_s.T + b_s                         # (B, C, P)
    trend_out = trend_init @ w_t.T + b_t
    return jnp.transpose(seasonal_out + trend_out, (0, 2, 1))          # (B, P, C)


if __name__ == "__main__":
    # Small, forward-consistent shapes.
    B, seq_len, pred_len, enc_in = 2, 16, 8, 4

    key = jax.random.PRNGKey(0)
    kx, kws, kbs, kwt, kbt = jax.random.split(key, 5)

    x = jax.random.normal(kx, (B, seq_len, enc_in), dtype=jnp.float32)

    # nn.Linear-style uniform(-1/sqrt(L), 1/sqrt(L)) init.
    bound = 1.0 / (seq_len ** 0.5)
    w_seasonal = jax.random.uniform(kws, (pred_len, seq_len), jnp.float32, -bound, bound)
    b_seasonal = jax.random.uniform(kbs, (pred_len,), jnp.float32, -bound, bound)
    w_trend = jax.random.uniform(kwt, (pred_len, seq_len), jnp.float32, -bound, bound)
    b_trend = jax.random.uniform(kbt, (pred_len,), jnp.float32, -bound, bound)

    # Precompute (hoisted): done once per model, not per forward.
    w_eff, b_eff = fold_dlinear_params(w_seasonal, b_seasonal, w_trend, b_trend, seq_len)

    out = dlinear_forward(x, w_eff, b_eff)
    out = jax.block_until_ready(out)

    ref = _reference(x, w_seasonal, b_seasonal, w_trend, b_trend)
    assert out.shape == (B, pred_len, enc_in)
    assert jnp.allclose(out, ref, atol=2e-4, rtol=2e-4), "mismatch vs reference"

    print("KERNEL_OK")
</pallas_src>

<mosaic_0001>
module attributes {stable_mosaic.version = 11 : i64} {
  func.func @_dlinear_kernel(%arg0: i32, %arg1: i32, %arg2: memref<8x16xf32, #tpu.memory_space<vmem>>, %arg3: memref<8x1xf32, #tpu.memory_space<vmem>>, %arg4: memref<2x16x4xf32, #tpu.memory_space<vmem>>, %arg5: memref<2x8x4xf32, #tpu.memory_space<vmem>>) attributes {dimension_semantics = [#tpu.dimension_semantics<parallel>, #tpu.dimension_semantics<parallel>], iteration_bounds = array<i64: 1, 1>, scalar_prefetch = 0 : i64, scratch_operands = 0 : i64, tpu.core_type = #tpu.core_type<tc>, window_params = [{pipeline_mode = #tpu.pipeline_mode<synchronous>, transform_indices = @transform_0, window_bounds = array<i64: 8, 16>}, {pipeline_mode = #tpu.pipeline_mode<synchronous>, transform_indices = @transform_1, window_bounds = array<i64: 8, 1>}, {transform_indices = @transform_2, window_bounds = array<i64: 2, 16, 4>}, {transform_indices = @transform_3, window_bounds = array<i64: 2, 8, 4>}]} {
    %c0 = arith.constant 0 : index
    %c0_0 = arith.constant 0 : index
    %0 = vector.load %arg2[%c0, %c0_0] : memref<8x16xf32, #tpu.memory_space<vmem>>, vector<8x16xf32>
    %c0_1 = arith.constant 0 : index
    %c0_2 = arith.constant 0 : index
    %1 = vector.load %arg3[%c0_1, %c0_2] : memref<8x1xf32, #tpu.memory_space<vmem>>, vector<8x1xf32>
    %c0_3 = arith.constant 0 : index
    %c0_4 = arith.constant 0 : index
    %c0_5 = arith.constant 0 : index
    %2 = vector.load %arg4[%c0_3, %c0_4, %c0_5] : memref<2x16x4xf32, #tpu.memory_space<vmem>>, vector<1x16x4xf32>
    %3 = vector.shape_cast %2 : vector<1x16x4xf32> to vector<16x4xf32>
    %cst = arith.constant dense<0.000000e+00> : vector<8x4xf32>
    %4 = tpu.matmul %0, %3, %cst {dimension_numbers = #tpu.dot_dimension_numbers<[1], [0], [0], [1], [0, 0, 1, 1], [], []>} : vector<8x16xf32>, vector<16x4xf32>, vector<8x4xf32> -> vector<8x4xf32>
    %5 = vector.broadcast %1 : vector<8x1xf32> to vector<8x4xf32>
    %6 = arith.addf %4, %5 : vector<8x4xf32>
    %c0_6 = arith.constant 0 : index
    %c0_7 = arith.constant 0 : index
    %c0_8 = arith.constant 0 : index
    %7 = vector.load %arg5[%c0_6, %c0_7, %c0_8] : memref<2x8x4xf32, #tpu.memory_space<vmem>>, vector<1x8x4xf32>
    %8 = vector.shape_cast %7 : vector<1x8x4xf32> to vector<8x4xf32>
    %9 = vector.shape_cast %6 : vector<8x4xf32> to vector<1x8x4xf32>
    tpu.vector_store %arg5[%c0_6, %c0_7, %c0_8], %9 {strides = array<i32>} : memref<2x8x4xf32, #tpu.memory_space<vmem>>, vector<1x8x4xf32>,
    %c1 = arith.constant 1 : index
    %c0_9 = arith.constant 0 : index
    %c0_10 = arith.constant 0 : index
    %10 = vector.load %arg4[%c1, %c0_9, %c0_10] : memref<2x16x4xf32, #tpu.memory_space<vmem>>, vector<1x16x4xf32>
    %11 = vector.shape_cast %10 : vector<1x16x4xf32> to vector<16x4xf32>
    %cst_11 = arith.constant dense<0.000000e+00> : vector<8x4xf32>
    %12 = tpu.matmul %0, %11, %cst_11 {dimension_numbers = #tpu.dot_dimension_numbers<[1], [0], [0], [1], [0, 0, 1, 1], [], []>} : vector<8x16xf32>, vector<16x4xf32>, vector<8x4xf32> -> vector<8x4xf32>
    %13 = vector.broadcast %1 : vector<8x1xf32> to vector<8x4xf32>
    %14 = arith.addf %12, %13 : vector<8x4xf32>
    %c1_12 = arith.constant 1 : index
    %c0_13 = arith.constant 0 : index
    %c0_14 = arith.constant 0 : index
    %15 = vector.load %arg5[%c1_12, %c0_13, %c0_14] : memref<2x8x4xf32, #tpu.memory_space<vmem>>, vector<1x8x4xf32>
    %16 = vector.shape_cast %15 : vector<1x8x4xf32> to vector<8x4xf32>
    %17 = vector.shape_cast %14 : vector<8x4xf32> to vector<1x8x4xf32>
    tpu.vector_store %arg5[%c1_12, %c0_13, %c0_14], %17 {strides = array<i32>} : memref<2x8x4xf32, #tpu.memory_space<vmem>>, vector<1x8x4xf32>,
    return
  }
  func.func @transform_0(%arg0: i32, %arg1: i32) -> (i32, i32) {
    %c0_i32 = arith.constant 0 : i32
    %c0_i32_0 = arith.constant 0 : i32
    %c0_i32_1 = arith.constant 0 : i32
    return %c0_i32, %c0_i32_0 : i32, i32
  }
  func.func @transform_1(%arg0: i32, %arg1: i32) -> (i32, i32) {
    %c0_i32 = arith.constant 0 : i32
    %c0_i32_0 = arith.constant 0 : i32
    %c0_i32_1 = arith.constant 0 : i32
    return %c0_i32, %c0_i32_0 : i32, i32
  }
  func.func @transform_2(%arg0: i32, %arg1: i32) -> (i32, i32, i32) {
    %c0_i32 = arith.constant 0 : i32
    %c0_i32_0 = arith.constant 0 : i32
    return %arg0, %c0_i32, %arg1 : i32, i32, i32
  }
  func.func @transform_3(%arg0: i32, %arg1: i32) -> (i32, i32, i32) {
    %c0_i32 = arith.constant 0 : i32
    %c0_i32_0 = arith.constant 0 : i32
    return %arg0, %c0_i32, %arg1 : i32, i32, i32
  }
}

</mosaic_0001>

<bundles_post_ra>
// kernel: tpu_custom_call.1
= control target key start
LH: loop header
LB: loop body
LE: loop exit
PB: predicated region body
PF: predicated region fallthrough
CT: control target
= control target key end

     0   :  { %v85_v3 = vmov 0   ;;  %vm23_vm0 = vcmask 130048   ;;  %vm47_vm1 = vcmask 31744   ;;  %s130_s2 = inlined_call_operand.vmem [shape: f32[2,16,4], index: 2, kind: input, shape index: {}]   ;;  %s131_s0 = inlined_call_operand.vmem [shape: f32[8,16], index: 0, kind: input, shape index: {}]   ;;  %s132_s1 = inlined_call_operand.vmem [shape: f32[8,1], index: 1, kind: input, shape index: {}]   ;;  %s133_s3 = inlined_call_operand.vmem [shape: f32[2,8,4], index: 3, kind: output, shape index: {}]  }
   0x1   :  { %v17_v0 = vld [vmem:[%s130_s2 + $0x8] sm:$0xff]  ;;  %v80_v1 = vld [vmem:[%s130_s2 + $0x18] sm:$0xff]  ;;  %v16_v2 = vld [vmem:[%s130_s2] sm:$0xff]  ;;  %84 = vset.pattern.permute.xlu0 %v85_v3 }
   0x2   :  { %41 = vmatpush.msra.mxu0 %v17_v0  ;;  %66 = vmatpush.msra.mxu1 %v80_v1  ;;  %v79_v4 = vld [vmem:[%s130_s2 + $0x10] sm:$0xff]  ;;  %v14_v5 = vld [vmem:[%s131_s0] sm:$0xff] }
   0x3   :  { %v15_v6 = vld [vmem:[%s132_s1] sm:$0xff] }
   0x4   :  { %20 = vperm.xlu0 %84, %v15_v6   ;;  %42 = vmatpush.msra.mxu0 %v16_v2 }
   0x5   :  { %67 = vmatpush.msra.mxu1 %v79_v4  ;;  %78 = vmatmul.msk.f32.vlgmr.msra.gmra.mxu0 %vm23_vm0, %v14_v5 }
   0x6   :  { %81 = vmatmul.msk.f32.vlgmr.msra.gmra.mxu1 %vm23_vm0, %v14_v5 }
  0x76   :  { %v21_v7 = vpop.permute.xlu0 %20 }
  0x82   :  { %v44_v8 = vpop.f32.mrf.mxu0 }
  0x83   :  { %v69_v9 = vpop.f32.mrf.mxu1  ;;  %v45_v10 = vadd.f32 %v44_v8, %v21_v7 }
  0x84   :  { %v70_v11 = vadd.f32 %v69_v9, %v21_v7 }
  0x85   :  { %48 = vst.msk [vmem:[%s133_s3] sm:$0xff] %vm47_vm1, %v45_v10 }
  0x86   :  { %82 = vst.msk [vmem:[%s133_s3 + $0x8] sm:$0xff] %vm47_vm1, %v70_v11 }

</bundles_post_ra>
